<compile_context>
chip_gen: v5e
topology: v5e:2x2
jax: 0.10.0
libtpu: 0.0.40
codegen_flags: <defaults>
</compile_context>

<pallas_src>
import jax
import jax.numpy as jnp
from jax.experimental import pallas as pl
from jax.experimental.pallas import tpu as pltpu


# ----------------------------------------------------------------------------
# Wrapper-side operand preparation (pure JAX; layout plumbing only).
# ----------------------------------------------------------------------------
def _banded_weight(w_kh, wp, wo, stride):
    """Block-banded matrix folding kw, width and stride into one matmul.

    w_kh: (3, ci, co) conv taps along kw for a fixed kh.
    Returns (wp*ci, wo*co) with
        out[m*ci + c, j*co + o] = w_kh[m - stride*j, c, o] if 0 <= m-stride*j <= 2
                                   0                        otherwise
    so that (row_slab @ out)[i, j*co + o] =
        sum_{kw,c} x_pad[i, (stride*j + kw)*ci + c] * w[kh, kw, c, o].
    """
    ci, co = w_kh.shape[1], w_kh.shape[2]
    m = jnp.arange(wp)
    j = jnp.arange(wo)
    rel = m[None, :] - stride * j[:, None]                    # (wo, wp)
    valid = (rel >= 0) & (rel <= 2)
    sel = jnp.where(valid[:, :, None, None],
                    w_kh[jnp.clip(rel, 0, 2)],                # (wo, wp, ci, co)
                    0.0)
    return sel.transpose(1, 2, 0, 3).reshape(wp * ci, wo * co)


def _conv_taps(w_hwio, wp, wo, stride):
    """Stack the 3 per-kh banded matrices: (3, wp*ci, wo*co)."""
    return jnp.stack(
        [_banded_weight(w_hwio[kh], wp, wo, stride) for kh in range(3)], axis=0)


def _parity_row_selector(ho):
    """(2*ho+1, 2*ho+2) constant 0/1 gather matrix for stride-2 stages.

    Applied to the full padded slab (2*ho+2 rows) it produces, in ONE matmul:
      rows 0..ho       -> even padded rows 0, 2, ..., 2*ho  (kh=0 uses [0:ho],
                          kh=2 uses [1:ho+1])
      rows ho+1..2*ho  -> odd  padded rows 1, 3, ..., 2*ho-1 (kh=1)
    """
    hp = 2 * ho + 2
    r = jnp.arange(hp)
    even = (r[None, :] == 2 * jnp.arange(ho + 1)[:, None])
    odd = (r[None, :] == 2 * jnp.arange(ho)[:, None] + 1)
    return jnp.concatenate([even, odd], axis=0).astype(jnp.float32)


def _full_block(arr):
    nd = arr.ndim
    return pl.BlockSpec(arr.shape, lambda b, _nd=nd: (0,) * _nd)


# ----------------------------------------------------------------------------
# Fused kernel (one grid step == one image; everything stays in VMEM).
# ----------------------------------------------------------------------------
def _make_kernel(H, W, cin, stage_meta):
    n_stages = len(stage_meta)

    def kernel(*refs):
        it = iter(refs)
        x_ref = next(it)                                  # (1, H, W*cin)
        stage_refs = []
        for meta in stage_meta:
            w_ref = next(it)                              # (3, K, N) banded taps
            s_ref = next(it) if meta["stride"] == 2 else None
            b_ref = next(it) if meta["has_bias"] else None
            stage_refs.append((w_ref, s_ref, b_ref))
        m1_ref = next(it)                                 # (w*c, 16) pool+fc1
        fc1b_ref = next(it)
        fc2w_ref = next(it)
        fc2b_ref = next(it)
        o_ref = next(it)                                  # (1, 1, out_dim)
        pads = list(it)                                   # padded VMEM slabs

        # Zero the padded buffers (halo stays zero; interiors are overwritten
        # below before they are read).  Slabs are tiny (< a few KiB each).
        for p in pads:
            p[...] = jnp.zeros_like(p)

        # Stage-0 input: copy the image slab into the padded scratch interior.
        pads[0][1:H + 1, cin:cin + W * cin] = x_ref[0]

        slab = None
        for s_idx, meta in enumerate(stage_meta):
            w_ref, s_ref, b_ref = stage_refs[s_idx]
            ho, wo, co = meta["out"]
            src = pads[s_idx]
            if meta["stride"] == 1:
                # 3 row-slab matmuls, one per kh tap (overlapping row windows).
                acc = jnp.zeros((ho, wo * co), jnp.float32)
                for kh in range(3):
                    acc = acc + jnp.dot(src[kh:kh + ho, :], w_ref[kh],
                                        preferred_element_type=jnp.float32)
            else:
                # ONE parity gather matmul pulls out all even + odd padded rows,
                # then 3 banded weight matmuls on slices of the gathered rows.
                sel = s_ref[...]                          # (2*ho+1, 2*ho+2)
                g = jnp.dot(sel, src[...],
                            preferred_element_type=jnp.float32)
                acc = (jnp.dot(g[0:ho], w_ref[0],         # even rows 0,2,..,2ho-2
                               preferred_element_type=jnp.float32)
                       + jnp.dot(g[ho + 1:2 * ho + 1], w_ref[1],  # odd rows
                                 preferred_element_type=jnp.float32)
                       + jnp.dot(g[1:ho + 1], w_ref[2],   # even rows 2,4,..,2ho
                                 preferred_element_type=jnp.float32))
            if b_ref is not None:
                acc = acc + b_ref[...]
            if meta["act"] == "relu":
                acc = jnp.maximum(acc, 0.0)
            else:                                         # LeakyReLU(0.2)
                acc = jnp.where(acc > 0.0, acc, 0.2 * acc)
            if s_idx + 1 < n_stages:
                pads[s_idx + 1][1:ho + 1, co:co + wo * co] = acc
            else:
                slab = acc

        # Head (fused epilogue): mean-pool is folded into m1; then fc1 ->
        # LeakyReLU -> fc2 -> tanh.
        pooled = jnp.sum(slab, axis=0, keepdims=True)     # (1, w*c)
        hv = jnp.dot(pooled, m1_ref[...],
                     preferred_element_type=jnp.float32) + fc1b_ref[...]
        hv = jnp.where(hv > 0.0, hv, 0.2 * hv)
        ov = jnp.dot(hv, fc2w_ref[...],
                     preferred_element_type=jnp.float32) + fc2b_ref[...]
        o_ref[0] = jnp.tanh(ov)

    return kernel


# ----------------------------------------------------------------------------
# Forward pass (single fused pallas_call) and pure-JAX reference.
# ----------------------------------------------------------------------------
def global_encoder_forward(params, hf_seg):
    """hf_seg: (B, 1 + n_classes, H, W) float32 (torch NCHW interface)."""
    B, cin, H, W = hf_seg.shape
    assert H % 2 == 0 and W % 2 == 0
    # NCHW -> (B, H, W*cin) row slabs (channel fastest within a column block).
    x = jnp.transpose(hf_seg, (0, 2, 3, 1)).reshape(B, H, W * cin)

    # Fused stem: hf_conv and seg_conv read disjoint channels and their outputs
    # are concatenated -> one conv with a block-diagonal weight + concat bias.
    w_hf, b_hf = params["w_hf"], params["b_hf"]
    w_seg, b_seg = params["w_seg"], params["b_seg"]
    c_hf = w_hf.shape[-1]
    c0 = c_hf + w_seg.shape[-1]
    w_stem = jnp.zeros((3, 3, cin, c0), jnp.float32)
    w_stem = w_stem.at[:, :, :1, :c_hf].set(w_hf)
    w_stem = w_stem.at[:, :, 1:, c_hf:].set(w_seg)
    b_stem = jnp.concatenate([b_hf, b_seg], axis=-1)          # (1, c0)

    # Per-stage prepared operands + static metadata.
    stage_arrays, stage_meta = [], []
    h, w, c = H, W, cin
    ho, wo, co = h // 2, w // 2, c0
    stage_arrays.append((_conv_taps(w_stem, w + 2, wo, 2),
                         _parity_row_selector(ho),
                         jnp.tile(b_stem, (1, wo))))
    stage_meta.append(dict(stride=2, act="leaky", has_bias=True, out=(ho, wo, co)))
    h, w, c = ho, wo, co

    for blk in params["blocks"]:
        w1, w2 = blk["w1"], blk["w2"]                         # (3,3,c,c), (3,3,c,2c)
        stage_arrays.append((_conv_taps(w1, w + 2, w, 1), None, None))
        stage_meta.append(dict(stride=1, act="relu", has_bias=False, out=(h, w, c)))
        assert h % 2 == 0 and w % 2 == 0
        ho, wo, co = h // 2, w // 2, 2 * c
        stage_arrays.append((_conv_taps(w2, w + 2, wo, 2),
                             _parity_row_selector(ho), None))
        # The module's LeakyReLU(0.2) after the block's trailing ReLU is the
        # identity on non-negative values, so plain ReLU is exact here.
        stage_meta.append(dict(stride=2, act="relu", has_bias=False, out=(ho, wo, co)))
        h, w, c = ho, wo, co

    # Head operands: spatial mean-pool folded into fc1's weight.
    m1 = jnp.tile(params["fc1_w"], (w, 1)) / float(h * w)     # (w*c, 16)
    fc1_b, fc2_w, fc2_b = params["fc1_b"], params["fc2_w"], params["fc2_b"]
    out_dim = fc2_w.shape[-1]

    # Flat inputs + BlockSpecs (weights: full blocks, resident across the grid).
    inputs = [x]
    in_specs = [pl.BlockSpec((1, H, W * cin), lambda b: (b, 0, 0))]
    for arrs in stage_arrays:
        for a in arrs:
            if a is not None:
                inputs.append(a)
                in_specs.append(_full_block(a))
    for a in (m1, fc1_b, fc2_w, fc2_b):
        inputs.append(a)
        in_specs.append(_full_block(a))

    # VMEM scratch: one zero-padded slab per conv-stage input (tiny, << 1 MiB).
    scratch_shapes = [pltpu.VMEM((H + 2, (W + 2) * cin), jnp.float32)]
    for meta in stage_meta[:-1]:
        oh, ow, oc = meta["out"]
        scratch_shapes.append(pltpu.VMEM((oh + 2, (ow + 2) * oc), jnp.float32))

    kernel = _make_kernel(H, W, cin, tuple(stage_meta))
    res = pl.pallas_call(
        kernel,
        out_shape=jax.ShapeDtypeStruct((B, 1, out_dim), jnp.float32),
        grid=(B,),
        in_specs=in_specs,
        out_specs=pl.BlockSpec((1, 1, out_dim), lambda b: (b, 0, 0)),
        scratch_shapes=scratch_shapes,
        compiler_params=pltpu.CompilerParams(
            dimension_semantics=("parallel",)),
    )(*inputs)
    return res.reshape(B, out_dim)


def reference_forward(params, hf_seg_nchw):
    x = jnp.transpose(hf_seg_nchw, (0, 2, 3, 1))

    def conv(v, w, b, stride):
        y = jax.lax.conv_general_dilated(v, w, (stride, stride), ((1, 1), (1, 1)),
                                         dimension_numbers=("NHWC", "HWIO", "NHWC"))
        return y if b is None else y + b.reshape(1, 1, 1, -1)

    lrelu = lambda v: jnp.where(v > 0, v, 0.2 * v)
    hf = lrelu(conv(x[..., :1], params["w_hf"], params["b_hf"], 2))
    seg = lrelu(conv(x[..., 1:], params["w_seg"], params["b_seg"], 2))
    out = jnp.concatenate([hf, seg], axis=-1)
    for blk in params["blocks"]:
        out = jax.nn.relu(conv(out, blk["w1"], None, 1))
        out = lrelu(jax.nn.relu(conv(out, blk["w2"], None, 2)))
    feat = out.reshape(out.shape[0], -1, out.shape[-1]).mean(axis=1)
    h = lrelu(feat @ params["fc1_w"] + params["fc1_b"])
    return jnp.tanh(h @ params["fc2_w"] + params["fc2_b"])


# ----------------------------------------------------------------------------
# Parameters (deterministic synthetic init; shapes follow the torch module).
# ----------------------------------------------------------------------------
def init_params(key, n_classes=4, n_blocks=2, out_dim=16):
    keys = jax.random.split(key, 16)

    def w(k, shape, scale=0.1):
        return scale * jax.random.normal(k, shape, jnp.float32)

    params = {
        "w_hf": w(keys[0], (3, 3, 1, 8)),            # Conv2d(1, 8, 3, s=2, p=1)
        "b_hf": w(keys[1], (1, 8)),
        "w_seg": w(keys[2], (3, 3, n_classes, 8)),   # Conv2d(n_classes, 8, ...)
        "b_seg": w(keys[3], (1, 8)),
    }
    blocks = []
    c = 16
    ki = 4
    for _ in range(1, n_blocks):
        blocks.append({
            "w1": w(keys[ki], (3, 3, c, c)),          # stride-1 conv, no bias
            "w2": w(keys[ki + 1], (3, 3, c, 2 * c)),  # stride-2 conv, no bias
        })
        ki += 2
        c *= 2
    params["blocks"] = blocks
    params["fc1_w"] = w(keys[ki], (c, 16))
    params["fc1_b"] = w(keys[ki + 1], (1, 16))
    params["fc2_w"] = w(keys[ki + 2], (16, out_dim))
    params["fc2_b"] = w(keys[ki + 3], (1, out_dim))
    return params


if __name__ == "__main__":
    n_classes, n_blocks, out_dim = 4, 2, 16
    key = jax.random.PRNGKey(0)
    kp, kx = jax.random.split(key)
    params = init_params(kp, n_classes=n_classes, n_blocks=n_blocks, out_dim=out_dim)

    # hf_seg: (B, 1 + n_classes, H, W)  -- torch NCHW interface
    hf_seg = jax.random.normal(kx, (2, 1 + n_classes, 16, 16), jnp.float32)

    fwd = jax.jit(global_encoder_forward)
    cond = jax.block_until_ready(fwd(params, hf_seg))
    ref = jax.block_until_ready(reference_forward(params, hf_seg))

    assert cond.shape == (2, out_dim), cond.shape
    assert bool(jnp.all(jnp.isfinite(cond)))
    err = float(jnp.max(jnp.abs(cond - ref)))
    assert err < 1e-2, err
    print("KERNEL_OK")
</pallas_src>

<mosaic_0001>
module attributes {stable_mosaic.version = 11 : i64} {
  func.func @kernel(%arg0: i32, %arg1: memref<1x16x80xf32, #tpu.memory_space<vmem>>, %arg2: memref<3x90x128xf32, #tpu.memory_space<vmem>>, %arg3: memref<17x18xf32, #tpu.memory_space<vmem>>, %arg4: memref<1x128xf32, #tpu.memory_space<vmem>>, %arg5: memref<3x160x128xf32, #tpu.memory_space<vmem>>, %arg6: memref<3x160x128xf32, #tpu.memory_space<vmem>>, %arg7: memref<9x10xf32, #tpu.memory_space<vmem>>, %arg8: memref<128x16xf32, #tpu.memory_space<vmem>>, %arg9: memref<1x16xf32, #tpu.memory_space<vmem>>, %arg10: memref<16x16xf32, #tpu.memory_space<vmem>>, %arg11: memref<1x16xf32, #tpu.memory_space<vmem>>, %arg12: memref<1x1x16xf32, #tpu.memory_space<vmem>>, %arg13: memref<18x90xf32, #tpu.memory_space<vmem>>, %arg14: memref<10x160xf32, #tpu.memory_space<vmem>>, %arg15: memref<10x160xf32, #tpu.memory_space<vmem>>) attributes {dimension_semantics = [#tpu.dimension_semantics<parallel>], iteration_bounds = array<i64: 2>, scalar_prefetch = 0 : i64, scratch_operands = 3 : i64, tpu.core_type = #tpu.core_type<tc>, window_params = [{transform_indices = @transform_0, window_bounds = array<i64: 1, 16, 80>}, {pipeline_mode = #tpu.pipeline_mode<synchronous>, transform_indices = @transform_1, window_bounds = array<i64: 3, 90, 128>}, {pipeline_mode = #tpu.pipeline_mode<synchronous>, transform_indices = @transform_2, window_bounds = array<i64: 17, 18>}, {pipeline_mode = #tpu.pipeline_mode<synchronous>, transform_indices = @transform_3, window_bounds = array<i64: 1, 128>}, {pipeline_mode = #tpu.pipeline_mode<synchronous>, transform_indices = @transform_4, window_bounds = array<i64: 3, 160, 128>}, {pipeline_mode = #tpu.pipeline_mode<synchronous>, transform_indices = @transform_5, window_bounds = array<i64: 3, 160, 128>}, {pipeline_mode = #tpu.pipeline_mode<synchronous>, transform_indices = @transform_6, window_bounds = array<i64: 9, 10>}, {pipeline_mode = #tpu.pipeline_mode<synchronous>, transform_indices = @transform_7, window_bounds = array<i64: 128, 16>}, {pipeline_mode = #tpu.pipeline_mode<synchronous>, transform_indices = @transform_8, window_bounds = array<i64: 1, 16>}, {pipeline_mode = #tpu.pipeline_mode<synchronous>, transform_indices = @transform_9, window_bounds = array<i64: 16, 16>}, {pipeline_mode = #tpu.pipeline_mode<synchronous>, transform_indices = @transform_10, window_bounds = array<i64: 1, 16>}, {transform_indices = @transform_11, window_bounds = array<i64: 1, 1, 16>}]} {
    %cst = arith.constant 0.000000e+00 : f32
    %0 = vector.broadcast %cst : f32 to vector<18x90xf32>
    %c0 = arith.constant 0 : index
    %c0_0 = arith.constant 0 : index
    %1 = vector.load %arg13[%c0, %c0_0] : memref<18x90xf32, #tpu.memory_space<vmem>>, vector<18x90xf32>
    tpu.vector_store %arg13[%c0, %c0_0], %0 {strides = array<i32>} : memref<18x90xf32, #tpu.memory_space<vmem>>, vector<18x90xf32>,
    %cst_1 = arith.constant 0.000000e+00 : f32
    %2 = vector.broadcast %cst_1 : f32 to vector<10x160xf32>
    %c0_2 = arith.constant 0 : index
    %c0_3 = arith.constant 0 : index
    %3 = vector.load %arg14[%c0_2, %c0_3] : memref<10x160xf32, #tpu.memory_space<vmem>>, vector<10x160xf32>
    tpu.vector_store %arg14[%c0_2, %c0_3], %2 {strides = array<i32>} : memref<10x160xf32, #tpu.memory_space<vmem>>, vector<10x160xf32>,
    %cst_4 = arith.constant 0.000000e+00 : f32
    %4 = vector.broadcast %cst_4 : f32 to vector<10x160xf32>
    %c0_5 = arith.constant 0 : index
    %c0_6 = arith.constant 0 : index
    %5 = vector.load %arg15[%c0_5, %c0_6] : memref<10x160xf32, #tpu.memory_space<vmem>>, vector<10x160xf32>
    tpu.vector_store %arg15[%c0_5, %c0_6], %4 {strides = array<i32>} : memref<10x160xf32, #tpu.memory_space<vmem>>, vector<10x160xf32>,
    %c0_7 = arith.constant 0 : index
    %c0_8 = arith.constant 0 : index
    %c0_9 = arith.constant 0 : index
    %6 = vector.load %arg1[%c0_7, %c0_8, %c0_9] : memref<1x16x80xf32, #tpu.memory_space<vmem>>, vector<1x16x80xf32>
    %7 = vector.shape_cast %6 : vector<1x16x80xf32> to vector<16x80xf32>
    %c1 = arith.constant 1 : index
    %c5 = arith.constant 5 : index
    %8 = vector.load %arg13[%c1, %c5] : memref<18x90xf32, #tpu.memory_space<vmem>>, vector<16x80xf32>
    tpu.vector_store %arg13[%c1, %c5], %7 {strides = array<i32>} : memref<18x90xf32, #tpu.memory_space<vmem>>, vector<16x80xf32>,
    %c0_10 = arith.constant 0 : index
    %c0_11 = arith.constant 0 : index
    %9 = vector.load %arg3[%c0_10, %c0_11] : memref<17x18xf32, #tpu.memory_space<vmem>>, vector<17x18xf32>
    %c0_12 = arith.constant 0 : index
    %c0_13 = arith.constant 0 : index
    %10 = vector.load %arg13[%c0_12, %c0_13] : memref<18x90xf32, #tpu.memory_space<vmem>>, vector<18x90xf32>
    %cst_14 = arith.constant dense<0.000000e+00> : vector<17x90xf32>
    %11 = tpu.matmul %9, %10, %cst_14 {dimension_numbers = #tpu.dot_dimension_numbers<[1], [0], [0], [1], [0, 0, 1, 1], [], []>} : vector<17x18xf32>, vector<18x90xf32>, vector<17x90xf32> -> vector<17x90xf32>
    %12 = vector.extract_strided_slice %11 {offsets = [0, 0], sizes = [8, 90], strides = [1, 1]} : vector<17x90xf32> to vector<8x90xf32>
    %c0_15 = arith.constant 0 : index
    %c0_16 = arith.constant 0 : index
    %c0_17 = arith.constant 0 : index
    %13 = vector.load %arg2[%c0_15, %c0_16, %c0_17] : memref<3x90x128xf32, #tpu.memory_space<vmem>>, vector<1x90x128xf32>
    %14 = vector.shape_cast %13 : vector<1x90x128xf32> to vector<90x128xf32>
    %cst_18 = arith.constant dense<0.000000e+00> : vector<8x128xf32>
    %15 = tpu.matmul %12, %14, %cst_18 {dimension_numbers = #tpu.dot_dimension_numbers<[1], [0], [0], [1], [0, 0, 1, 1], [], []>} : vector<8x90xf32>, vector<90x128xf32>, vector<8x128xf32> -> vector<8x128xf32>
    %16 = vector.extract_strided_slice %11 {offsets = [9, 0], sizes = [8, 90], strides = [1, 1]} : vector<17x90xf32> to vector<8x90xf32>
    %c1_19 = arith.constant 1 : index
    %c0_20 = arith.constant 0 : index
    %c0_21 = arith.constant 0 : index
    %17 = vector.load %arg2[%c1_19, %c0_20, %c0_21] : memref<3x90x128xf32, #tpu.memory_space<vmem>>, vector<1x90x128xf32>
    %18 = vector.shape_cast %17 : vector<1x90x128xf32> to vector<90x128xf32>
    %cst_22 = arith.constant dense<0.000000e+00> : vector<8x128xf32>
    %19 = tpu.matmul %16, %18, %cst_22 {dimension_numbers = #tpu.dot_dimension_numbers<[1], [0], [0], [1], [0, 0, 1, 1], [], []>} : vector<8x90xf32>, vector<90x128xf32>, vector<8x128xf32> -> vector<8x128xf32>
    %20 = arith.addf %15, %19 : vector<8x128xf32>
    %21 = vector.extract_strided_slice %11 {offsets = [1, 0], sizes = [8, 90], strides = [1, 1]} : vector<17x90xf32> to vector<8x90xf32>
    %c2 = arith.constant 2 : index
    %c0_23 = arith.constant 0 : index
    %c0_24 = arith.constant 0 : index
    %22 = vector.load %arg2[%c2, %c0_23, %c0_24] : memref<3x90x128xf32, #tpu.memory_space<vmem>>, vector<1x90x128xf32>
    %23 = vector.shape_cast %22 : vector<1x90x128xf32> to vector<90x128xf32>
    %cst_25 = arith.constant dense<0.000000e+00> : vector<8x128xf32>
    %24 = tpu.matmul %21, %23, %cst_25 {dimension_numbers = #tpu.dot_dimension_numbers<[1], [0], [0], [1], [0, 0, 1, 1], [], []>} : vector<8x90xf32>, vector<90x128xf32>, vector<8x128xf32> -> vector<8x128xf32>
    %25 = arith.addf %20, %24 : vector<8x128xf32>
    %c0_26 = arith.constant 0 : index
    %c0_27 = arith.constant 0 : index
    %26 = vector.load %arg4[%c0_26, %c0_27] : memref<1x128xf32, #tpu.memory_space<vmem>>, vector<1x128xf32>
    %27 = vector.broadcast %26 : vector<1x128xf32> to vector<8x128xf32>
    %28 = arith.addf %25, %27 : vector<8x128xf32>
    %cst_28 = arith.constant 0.000000e+00 : f32
    %29 = vector.broadcast %cst_28 : f32 to vector<8x128xf32>
    %30 = arith.cmpf ogt, %28, %29 : vector<8x128xf32>
    %cst_29 = arith.constant 2.000000e-01 : f32
    %31 = vector.broadcast %cst_29 : f32 to vector<8x128xf32>
    %32 = arith.mulf %31, %28 : vector<8x128xf32>
    %33 = arith.select %30, %28, %32 : vector<8x128xi1>, vector<8x128xf32>
    %c1_30 = arith.constant 1 : index
    %c16 = arith.constant 16 : index
    %34 = vector.load %arg14[%c1_30, %c16] : memref<10x160xf32, #tpu.memory_space<vmem>>, vector<8x128xf32>
    tpu.vector_store %arg14[%c1_30, %c16], %33 {strides = array<i32>} : memref<10x160xf32, #tpu.memory_space<vmem>>, vector<8x128xf32>,
    %cst_31 = arith.constant 0.000000e+00 : f32
    %35 = vector.broadcast %cst_31 : f32 to vector<8x128xf32>
    %c0_32 = arith.constant 0 : index
    %c0_33 = arith.constant 0 : index
    %36 = vector.load %arg14[%c0_32, %c0_33] : memref<10x160xf32, #tpu.memory_space<vmem>>, vector<8x160xf32>
    %c0_34 = arith.constant 0 : index
    %c0_35 = arith.constant 0 : index
    %c0_36 = arith.constant 0 : index
    %37 = vector.load %arg5[%c0_34, %c0_35, %c0_36] : memref<3x160x128xf32, #tpu.memory_space<vmem>>, vector<1x160x128xf32>
    %38 = vector.shape_cast %37 : vector<1x160x128xf32> to vector<160x128xf32>
    %cst_37 = arith.constant dense<0.000000e+00> : vector<8x128xf32>
    %39 = tpu.matmul %36, %38, %cst_37 {dimension_numbers = #tpu.dot_dimension_numbers<[1], [0], [0], [1], [0, 0, 1, 1], [], []>} : vector<8x160xf32>, vector<160x128xf32>, vector<8x128xf32> -> vector<8x128xf32>
    %40 = arith.addf %35, %39 : vector<8x128xf32>
    %c1_38 = arith.constant 1 : index
    %c0_39 = arith.constant 0 : index
    %41 = vector.load %arg14[%c1_38, %c0_39] : memref<10x160xf32, #tpu.memory_space<vmem>>, vector<8x160xf32>
    %c1_40 = arith.constant 1 : index
    %c0_41 = arith.constant 0 : index
    %c0_42 = arith.constant 0 : index
    %42 = vector.load %arg5[%c1_40, %c0_41, %c0_42] : memref<3x160x128xf32, #tpu.memory_space<vmem>>, vector<1x160x128xf32>
    %43 = vector.shape_cast %42 : vector<1x160x128xf32> to vector<160x128xf32>
    %cst_43 = arith.constant dense<0.000000e+00> : vector<8x128xf32>
    %44 = tpu.matmul %41, %43, %cst_43 {dimension_numbers = #tpu.dot_dimension_numbers<[1], [0], [0], [1], [0, 0, 1, 1], [], []>} : vector<8x160xf32>, vector<160x128xf32>, vector<8x128xf32> -> vector<8x128xf32>
    %45 = arith.addf %40, %44 : vector<8x128xf32>
    %c2_44 = arith.constant 2 : index
    %c0_45 = arith.constant 0 : index
    %46 = vector.load %arg14[%c2_44, %c0_45] : memref<10x160xf32, #tpu.memory_space<vmem>>, vector<8x160xf32>
    %c2_46 = arith.constant 2 : index
    %c0_47 = arith.constant 0 : index
    %c0_48 = arith.constant 0 : index
    %47 = vector.load %arg5[%c2_46, %c0_47, %c0_48] : memref<3x160x128xf32, #tpu.memory_space<vmem>>, vector<1x160x128xf32>
    %48 = vector.shape_cast %47 : vector<1x160x128xf32> to vector<160x128xf32>
    %cst_49 = arith.constant dense<0.000000e+00> : vector<8x128xf32>
    %49 = tpu.matmul %46, %48, %cst_49 {dimension_numbers = #tpu.dot_dimension_numbers<[1], [0], [0], [1], [0, 0, 1, 1], [], []>} : vector<8x160xf32>, vector<160x128xf32>, vector<8x128xf32> -> vector<8x128xf32>
    %50 = arith.addf %45, %49 : vector<8x128xf32>
    %cst_50 = arith.constant 0.000000e+00 : f32
    %51 = vector.broadcast %cst_50 : f32 to vector<8x128xf32>
    %52 = arith.maximumf %50, %51 : vector<8x128xf32>
    %c1_51 = arith.constant 1 : index
    %c16_52 = arith.constant 16 : index
    %53 = vector.load %arg15[%c1_51, %c16_52] : memref<10x160xf32, #tpu.memory_space<vmem>>, vector<8x128xf32>
    tpu.vector_store %arg15[%c1_51, %c16_52], %52 {strides = array<i32>} : memref<10x160xf32, #tpu.memory_space<vmem>>, vector<8x128xf32>,
    %c0_53 = arith.constant 0 : index
    %c0_54 = arith.constant 0 : index
    %54 = vector.load %arg7[%c0_53, %c0_54] : memref<9x10xf32, #tpu.memory_space<vmem>>, vector<9x10xf32>
    %c0_55 = arith.constant 0 : index
    %c0_56 = arith.constant 0 : index
    %55 = vector.load %arg15[%c0_55, %c0_56] : memref<10x160xf32, #tpu.memory_space<vmem>>, vector<10x160xf32>
    %cst_57 = arith.constant dense<0.000000e+00> : vector<9x160xf32>
    %56 = tpu.matmul %54, %55, %cst_57 {dimension_numbers = #tpu.dot_dimension_numbers<[1], [0], [0], [1], [0, 0, 1, 1], [], []>} : vector<9x10xf32>, vector<10x160xf32>, vector<9x160xf32> -> vector<9x160xf32>
    %57 = vector.extract_strided_slice %56 {offsets = [0, 0], sizes = [4, 160], strides = [1, 1]} : vector<9x160xf32> to vector<4x160xf32>
    %c0_58 = arith.constant 0 : index
    %c0_59 = arith.constant 0 : index
    %c0_60 = arith.constant 0 : index
    %58 = vector.load %arg6[%c0_58, %c0_59, %c0_60] : memref<3x160x128xf32, #tpu.memory_space<vmem>>, vector<1x160x128xf32>
    %59 = vector.shape_cast %58 : vector<1x160x128xf32> to vector<160x128xf32>
    %cst_61 = arith.constant dense<0.000000e+00> : vector<4x128xf32>
    %60 = tpu.matmul %57, %59, %cst_61 {dimension_numbers = #tpu.dot_dimension_numbers<[1], [0], [0], [1], [0, 0, 1, 1], [], []>} : vector<4x160xf32>, vector<160x128xf32>, vector<4x128xf32> -> vector<4x128xf32>
    %61 = vector.extract_strided_slice %56 {offsets = [5, 0], sizes = [4, 160], strides = [1, 1]} : vector<9x160xf32> to vector<4x160xf32>
    %c1_62 = arith.constant 1 : index
    %c0_63 = arith.constant 0 : index
    %c0_64 = arith.constant 0 : index
    %62 = vector.load %arg6[%c1_62, %c0_63, %c0_64] : memref<3x160x128xf32, #tpu.memory_space<vmem>>, vector<1x160x128xf32>
    %63 = vector.shape_cast %62 : vector<1x160x128xf32> to vector<160x128xf32>
    %cst_65 = arith.constant dense<0.000000e+00> : vector<4x128xf32>
    %64 = tpu.matmul %61, %63, %cst_65 {dimension_numbers = #tpu.dot_dimension_numbers<[1], [0], [0], [1], [0, 0, 1, 1], [], []>} : vector<4x160xf32>, vector<160x128xf32>, vector<4x128xf32> -> vector<4x128xf32>
    %65 = arith.addf %60, %64 : vector<4x128xf32>
    %66 = vector.extract_strided_slice %56 {offsets = [1, 0], sizes = [4, 160], strides = [1, 1]} : vector<9x160xf32> to vector<4x160xf32>
    %c2_66 = arith.constant 2 : index
    %c0_67 = arith.constant 0 : index
    %c0_68 = arith.constant 0 : index
    %67 = vector.load %arg6[%c2_66, %c0_67, %c0_68] : memref<3x160x128xf32, #tpu.memory_space<vmem>>, vector<1x160x128xf32>
    %68 = vector.shape_cast %67 : vector<1x160x128xf32> to vector<160x128xf32>
    %cst_69 = arith.constant dense<0.000000e+00> : vector<4x128xf32>
    %69 = tpu.matmul %66, %68, %cst_69 {dimension_numbers = #tpu.dot_dimension_numbers<[1], [0], [0], [1], [0, 0, 1, 1], [], []>} : vector<4x160xf32>, vector<160x128xf32>, vector<4x128xf32> -> vector<4x128xf32>
    %70 = arith.addf %65, %69 : vector<4x128xf32>
    %cst_70 = arith.constant 0.000000e+00 : f32
    %71 = vector.broadcast %cst_70 : f32 to vector<4x128xf32>
    %72 = arith.maximumf %70, %71 : vector<4x128xf32>
    %cst_71 = arith.constant dense<0.000000e+00> : vector<128xf32>
    %73 = vector.multi_reduction <add>, %72, %cst_71 [0] : vector<4x128xf32> to vector<128xf32>
    %74 = vector.shape_cast %73 : vector<128xf32> to vector<1x128xf32>
    %c0_72 = arith.constant 0 : index
    %c0_73 = arith.constant 0 : index
    %75 = vector.load %arg8[%c0_72, %c0_73] : memref<128x16xf32, #tpu.memory_space<vmem>>, vector<128x16xf32>
    %cst_74 = arith.constant dense<0.000000e+00> : vector<1x16xf32>
    %76 = tpu.matmul %74, %75, %cst_74 {dimension_numbers = #tpu.dot_dimension_numbers<[1], [0], [0], [1], [0, 0, 1, 1], [], []>} : vector<1x128xf32>, vector<128x16xf32>, vector<1x16xf32> -> vector<1x16xf32>
    %c0_75 = arith.constant 0 : index
    %c0_76 = arith.constant 0 : index
    %77 = vector.load %arg9[%c0_75, %c0_76] : memref<1x16xf32, #tpu.memory_space<vmem>>, vector<1x16xf32>
    %78 = arith.addf %76, %77 : vector<1x16xf32>
    %cst_77 = arith.constant 0.000000e+00 : f32
    %79 = vector.broadcast %cst_77 : f32 to vector<1x16xf32>
    %80 = arith.cmpf ogt, %78, %79 : vector<1x16xf32>
    %cst_78 = arith.constant 2.000000e-01 : f32
    %81 = vector.broadcast %cst_78 : f32 to vector<1x16xf32>
    %82 = arith.mulf %81, %78 : vector<1x16xf32>
    %83 = arith.select %80, %78, %82 : vector<1x16xi1>, vector<1x16xf32>
    %c0_79 = arith.constant 0 : index
    %c0_80 = arith.constant 0 : index
    %84 = vector.load %arg10[%c0_79, %c0_80] : memref<16x16xf32, #tpu.memory_space<vmem>>, vector<16x16xf32>
    %cst_81 = arith.constant dense<0.000000e+00> : vector<1x16xf32>
    %85 = tpu.matmul %83, %84, %cst_81 {dimension_numbers = #tpu.dot_dimension_numbers<[1], [0], [0], [1], [0, 0, 1, 1], [], []>} : vector<1x16xf32>, vector<16x16xf32>, vector<1x16xf32> -> vector<1x16xf32>
    %c0_82 = arith.constant 0 : index
    %c0_83 = arith.constant 0 : index
    %86 = vector.load %arg11[%c0_82, %c0_83] : memref<1x16xf32, #tpu.memory_space<vmem>>, vector<1x16xf32>
    %87 = arith.addf %85, %86 : vector<1x16xf32>
    %88 = math.tanh %87 : vector<1x16xf32>
    %c0_84 = arith.constant 0 : index
    %c0_85 = arith.constant 0 : index
    %c0_86 = arith.constant 0 : index
    %89 = vector.load %arg12[%c0_84, %c0_85, %c0_86] : memref<1x1x16xf32, #tpu.memory_space<vmem>>, vector<1x1x16xf32>
    %90 = vector.shape_cast %89 : vector<1x1x16xf32> to vector<1x16xf32>
    %91 = vector.shape_cast %88 : vector<1x16xf32> to vector<1x1x16xf32>
    tpu.vector_store %arg12[%c0_84, %c0_85, %c0_86], %91 {strides = array<i32>} : memref<1x1x16xf32, #tpu.memory_space<vmem>>, vector<1x1x16xf32>,
    return
  }
  func.func @transform_0(%arg0: i32) -> (i32, i32, i32) {
    %c0_i32 = arith.constant 0 : i32
    %c0_i32_0 = arith.constant 0 : i32
    %c0_i32_1 = arith.constant 0 : i32
    return %arg0, %c0_i32, %c0_i32_0 : i32, i32, i32
  }
  func.func @transform_1(%arg0: i32) -> (i32, i32, i32) {
    %c0_i32 = arith.constant 0 : i32
    %c0_i32_0 = arith.constant 0 : i32
    %c0_i32_1 = arith.constant 0 : i32
    %c0_i32_2 = arith.constant 0 : i32
    return %c0_i32, %c0_i32_0, %c0_i32_1 : i32, i32, i32
  }
  func.func @transform_2(%arg0: i32) -> (i32, i32) {
    %c0_i32 = arith.constant 0 : i32
    %c0_i32_0 = arith.constant 0 : i32
    %c0_i32_1 = arith.constant 0 : i32
    return %c0_i32, %c0_i32_0 : i32, i32
  }
  func.func @transform_3(%arg0: i32) -> (i32, i32) {
    %c0_i32 = arith.constant 0 : i32
    %c0_i32_0 = arith.constant 0 : i32
    %c0_i32_1 = arith.constant 0 : i32
    return %c0_i32, %c0_i32_0 : i32, i32
  }
  func.func @transform_4(%arg0: i32) -> (i32, i32, i32) {
    %c0_i32 = arith.constant 0 : i32
    %c0_i32_0 = arith.constant 0 : i32
    %c0_i32_1 = arith.constant 0 : i32
    %c0_i32_2 = arith.constant 0 : i32
    return %c0_i32, %c0_i32_0, %c0_i32_1 : i32, i32, i32
  }
  func.func @transform_5(%arg0: i32) -> (i32, i32, i32) {
    %c0_i32 = arith.constant 0 : i32
    %c0_i32_0 = arith.constant 0 : i32
    %c0_i32_1 = arith.constant 0 : i32
    %c0_i32_2 = arith.constant 0 : i32
    return %c0_i32, %c0_i32_0, %c0_i32_1 : i32, i32, i32
  }
  func.func @transform_6(%arg0: i32) -> (i32, i32) {
    %c0_i32 = arith.constant 0 : i32
    %c0_i32_0 = arith.constant 0 : i32
    %c0_i32_1 = arith.constant 0 : i32
    return %c0_i32, %c0_i32_0 : i32, i32
  }
  func.func @transform_7(%arg0: i32) -> (i32, i32) {
    %c0_i32 = arith.constant 0 : i32
    %c0_i32_0 = arith.constant 0 : i32
    %c0_i32_1 = arith.constant 0 : i32
    return %c0_i32, %c0_i32_0 : i32, i32
  }
  func.func @transform_8(%arg0: i32) -> (i32, i32) {
    %c0_i32 = arith.constant 0 : i32
    %c0_i32_0 = arith.constant 0 : i32
    %c0_i32_1 = arith.constant 0 : i32
    return %c0_i32, %c0_i32_0 : i32, i32
  }
  func.func @transform_9(%arg0: i32) -> (i32, i32) {
    %c0_i32 = arith.constant 0 : i32
    %c0_i32_0 = arith.constant 0 : i32
    %c0_i32_1 = arith.constant 0 : i32
    return %c0_i32, %c0_i32_0 : i32, i32
  }
  func.func @transform_10(%arg0: i32) -> (i32, i32) {
    %c0_i32 = arith.constant 0 : i32
    %c0_i32_0 = arith.constant 0 : i32
    %c0_i32_1 = arith.constant 0 : i32
    return %c0_i32, %c0_i32_0 : i32, i32
  }
  func.func @transform_11(%arg0: i32) -> (i32, i32, i32) {
    %c0_i32 = arith.constant 0 : i32
    %c0_i32_0 = arith.constant 0 : i32
    %c0_i32_1 = arith.constant 0 : i32
    return %arg0, %c0_i32, %c0_i32_0 : i32, i32, i32
  }
}

</mosaic_0001>

<bundles_post_ra>
// kernel: global_encoder_forward.1
= control target key start
LH: loop header
LB: loop body
LE: loop exit
PB: predicated region body
PF: predicated region fallthrough
CT: control target
= control target key end

     0   :  { %s2243_s0 = inlined_call_operand.vmem [shape: f32[2,16,80], index: 0, kind: input, shape index: {}]   ;;  %s2244_s1 = inlined_call_operand.vmem [shape: f32[3,90,128], index: 1, kind: input, shape index: {}]   ;;  %s2245_s2 = inlined_call_operand.vmem [shape: f32[17,18], index: 2, kind: input, shape index: {}]   ;;  %s2246_s3 = inlined_call_operand.vmem [shape: f32[1,128], index: 3, kind: input, shape index: {}]   ;;  %s2247_s4 = inlined_call_operand.vmem [shape: f32[3,160,128], index: 4, kind: input, shape index: {}]   ;;  %s2248_s5 = inlined_call_operand.vmem [shape: f32[3,160,128], index: 5, kind: input, shape index: {}]   ;;  %s2249_s6 = inlined_call_operand.vmem [shape: f32[9,10], index: 6, kind: input, shape index: {}]   ;;  %s2250_s7 = inlined_call_operand.vmem [shape: f32[128,16], index: 7, kind: input, shape index: {}]   ;;  %s2251_s8 = inlined_call_operand.vmem [shape: f32[1,16], index: 8, kind: input, shape index: {}]   ;;  %s2252_s9 = inlined_call_operand.vmem [shape: f32[16,16], index: 9, kind: input, shape index: {}]   ;;  %s2253_s10 = inlined_call_operand.vmem [shape: f32[1,16], index: 10, kind: input, shape index: {}]   ;;  %s2254_s11 = inlined_call_operand.hbm [shape: f32[2,1,16], index: 11, kind: output, shape index: {}]  }
   0x1   :  { %2256 = sst [smem:[#allocation8_spill]] %s2243_s0 }
   0x2   :  { %2257 = sst [smem:[#allocation9_spill]] %s2244_s1 }
   0x3   :  { %16 = vsyncpa [#allocation6], 0 }
   0x4   :  { %18 = vsyncpa [#allocation6 + $0x1], 0  ;;  %s1558_s17 = smov 0   ;;  %s1560_s18 = smov 0  }
   0x5   :  { %s1562_s19 = smov 0   ;;  %s1564_s20 = smov 0  }
   0x6 LB: > { %s1579_s21 = sadd.s32 4294967295, %s1493_s20   ;;  %s1250_s22 = sadd.s32 4294967294, %s1493_s20   ;;  %s1493_s20 = sphi %s1564_s20, %s2266_s20   ;;  %s1489_s19 = sphi %s1562_s19, %s2265_s19   ;;  %s1485_s18 = sphi %s1560_s18, %s2264_s18   ;;  %s1481_s17 = sphi %s1558_s17, %s2263_s17  }
   0x7   : > { %s1583_s23 = sadd.s32 1, %s1493_s20   ;;  %s267_s24 = sadd.s32 1, %s1489_s19 }
   0x8   : > { %s264_s25 = ssub.s32 %s1493_s20, %s1583_s23  ;;  %p277_p0 = scmp.ne.s32.totalorder %s1489_s19, %s1485_s18 }
   0x9   : > { %p265_p1 = scmp.eq.s32.totalorder %s264_s25, 0  ;;  %p278_p2 = scmp.eq.s32.totalorder %s1579_s21, 1 }
   0xa   : > { %p283_p3 = scmp.ne.s32.totalorder %s1485_s18, %s1481_s17  ;;  %p284_p4 = scmp.eq.s32.totalorder %s1250_s22, 1 }
   0xb   : > { %s1594_s26 = scalar_select %p265_p1, %s1489_s19, %s267_s24  }
   0xc   : > { %p1596_p5 = por %p278_p2, %p277_p0  ;;  %p1600_p6 = por %p284_p4, %p283_p3 }
   0xd   : > { %p1253_p7 = scmp.ge.s32.totalorder %s1493_s20, 1  ;;  %p340_p8 = scmp.lt.s32.totalorder %s1493_s20, 3 }
   0xf   : > { %p341_p9 = pnand %p1253_p7, %p340_p8 }
  0x10   : > { %p379_p10 = scmp.lt.s32.totalorder (!%p341_p9), %s1579_s21, 1  ;;  %s2260_s0 = sld [smem:[#allocation8_spill]] (!%p341_p9) }
  0x11   : > { %344 = sbr.rel (%p341_p9) target bundleno = 1430 (0x596), region = 64  ;;  %s1496_s15 = smov (!%p341_p9), 5  }
  0x12   : > { %s2261_s1 = sld [smem:[#allocation9_spill]] (!%p341_p9)  ;;  %s2262_s22 = smov (!%p341_p9), 16  }
  0x13   : > { %s377_s12 = sand.u32 (!%p341_p9), 1, %s1485_s18  }
  0x14   : > { %s378_s16 = scalar_lea.vmem (!%p341_p9), [#allocation5], %s377_s12 }
  0x16   : > { %vm384_vm0 = vcmask 736256   ;;  %vm387_vm1 = vcmask 730112   ;;  %v1495_v0 = vmov 0.0   ;;  %s380_s29 = scalar_select %p379_p10, %s1579_s21, 1  ;;  %vm409_vm2 = vcmask 695336   ;;  %v412_v21 = vld [vmem:[%s2245_s2] sm:$0xff] }
  0x17   : > { %386 = vst.msk [vmem:[#allocation2 + $0x8] sm:$0xff] %vm384_vm0, %v1495_v0  ;;  %vm428_vm3 = vcmask 1041408   ;;  %vm418_vm4 = vcmask 146432   ;;  %v413_v28 = vld [vmem:[%s2245_s2 + $0x8] sm:$0xff]  ;;  %v414_v29 = vld [vmem:[%s2245_s2 + $0x10] sm:$0x1] }
  0x18   : > { %388 = vst.msk [vmem:[#allocation2 + $0x10] sm:$0x3] %vm387_vm1, %v1495_v0  ;;  %s1385_s30 = sshll.u32 %s380_s29, 4  ;;  %v469_v4 = vld [vmem:[%s2261_s1 + $0x58] sm:$0x3]  ;;  %v468_v5 = vld [vmem:[%s2261_s1 + $0x50] sm:$0xff] }
  0x19   : > { %385 = vst.msk [vmem:[#allocation2] sm:$0xff] %vm384_vm0, %v1495_v0  ;;  %s383_s14 = scalar_lea.vmem %s2260_s0, %s1385_s30  ;;  %1274 = vmatpush.msk.msra.mxu2 %vm428_vm3, %v469_v4  ;;  %v467_v6 = vld [vmem:[%s2261_s1 + $0x48] sm:$0xff]  ;;  %v1287_v7 = vld [vmem:[%s2261_s1 + $0x118] sm:$0x3]  ;;  %v1286_v8 = vld [vmem:[%s2261_s1 + $0x110] sm:$0xff]  ;;  %vm485_vm5 = vcmask 1046528  }
  0x1a   : > { %389 = vst [vmem:[#allocation3] sm:$0xff] %v1495_v0  ;;  %v400_v1 = vld [vmem:[%s383_s14 + $0x8] sm:$0xff]  ;;  %v399_v2 = vld [vmem:[%s383_s14] sm:$0xff]  ;;  %1288 = vmatpush.msk.msra.mxu3 %vm428_vm3, %v1287_v7  ;;  %v465_v13 = vld [vmem:[%s2261_s1 + $0x38] sm:$0xff]  ;;  %vm390_vm6 = vcmask 261120   ;;  %vm393_vm7 = vcmask 254976  }
  0x1b   : > { %392 = vst [vmem:[#allocation3 + $0x10] sm:$0x3] %v1495_v0  ;;  %405 = vrot.lane.b32.xlu0 %v400_v1, %s1496_s15  ;;  %525 = vmatpush.msra.mxu2 %v468_v5  ;;  %v466_v11 = vld [vmem:[%s2261_s1 + $0x40] sm:$0xff]  ;;  %v1285_v12 = vld [vmem:[%s2261_s1 + $0x108] sm:$0xff]  ;;  %v464_v15 = vld [vmem:[%s2261_s1 + $0x30] sm:$0xff]  ;;  %s2255_s29 = smov 16  }
  0x1c   : > { %395 = vst [vmem:[#allocation4] sm:$0xff] %v1495_v0  ;;  %565 = vmatpush.msra.mxu3 %v1286_v8  ;;  %v1284_v14 = vld [vmem:[%s2261_s1 + $0x100] sm:$0xff]  ;;  %v1283_v16 = vld [vmem:[%s2261_s1 + $0xf8] sm:$0xff]  ;;  %v463_v17 = vld [vmem:[%s2261_s1 + $0x28] sm:$0xff]  ;;  %vm594_vm9 = vcmask 1047681   ;;  %vm596_vm10 = vcmask 130049  }
  0x1d   : > { %397 = vst [vmem:[#allocation4 + $0x10] sm:$0x3] %v1495_v0  ;;  %526 = vmatpush.msra.mxu2 %v467_v6  ;;  %v1282_v18 = vld [vmem:[%s2261_s1 + $0xf0] sm:$0xff]  ;;  %v462_v20 = vld [vmem:[%s2261_s1 + $0x20] sm:$0xff]  ;;  %v461_v23 = vld [vmem:[%s2261_s1 + $0x18] sm:$0xff]  ;;  %vm598_vm11 = vcmask 1040512  }
  0x1e   : > { %566 = vmatpush.msra.mxu3 %v1285_v12  ;;  %v1271_v24 = vld [vmem:[%s2261_s1 + $0xb8] sm:$0x3]  ;;  %v460_v25 = vld [vmem:[%s2261_s1 + $0x10] sm:$0xff]  ;;  %v459_v27 = vld [vmem:[%s2261_s1 + $0x8] sm:$0xff]  ;;  %391 = vst.msk [vmem:[#allocation3 + $0x8] sm:$0xff] %vm390_vm6, %v1495_v0  ;;  %vm600_vm12 = vcmask 122880  }
  0x1f   : > { %527 = vmatpush.msra.mxu2 %v466_v11  ;;  %v1270_v26 = vld [vmem:[%s2261_s1 + $0xb0] sm:$0xff]  ;;  %v458_v30 = vld [vmem:[%s2261_s1] sm:$0xff]  ;;  %v1269_v31 = vld [vmem:[%s2261_s1 + $0xa8] sm:$0xff]  ;;  %394 = vst.msk [vmem:[#allocation3 + $0x18] sm:$0x3] %vm393_vm7, %v1495_v0  ;;  %vm774_vm13 = vcmask 1045504  }
  0x20   : > { %567 = vmatpush.msra.mxu3 %v1284_v14  ;;  %v1281_v32 = vld [vmem:[%s2261_s1 + $0xe8] sm:$0xff]  ;;  %v1268_v33 = vld [vmem:[%s2261_s1 + $0xa0] sm:$0xff]  ;;  %v1267_v35 = vld [vmem:[%s2261_s1 + $0x98] sm:$0xff]  ;;  %396 = vst.msk [vmem:[#allocation4 + $0x8] sm:$0xff] %vm390_vm6, %v1495_v0  ;;  %vm841_vm14 = vcmask 80896   ;;  %vm945_vm15 = vcmask 1042432  }
  0x21   : > { %528 = vmatpush.msra.mxu2 %v465_v13  ;;  %v1280_v34 = vld [vmem:[%s2261_s1 + $0xe0] sm:$0xff]  ;;  %v1279_v36 = vld [vmem:[%s2261_s1 + $0xd8] sm:$0xff]  ;;  %v1266_v37 = vld [vmem:[%s2261_s1 + $0x90] sm:$0xff]  ;;  %398 = vst.msk [vmem:[#allocation4 + $0x18] sm:$0x3] %vm393_vm7, %v1495_v0 }
  0x22   : > { %568 = vmatpush.msra.mxu3 %v1283_v16  ;;  %v1278_v38 = vld [vmem:[%s2261_s1 + $0xd0] sm:$0xff]  ;;  %v1265_v39 = vld [vmem:[%s2261_s1 + $0x88] sm:$0xff]  ;;  %v1264_v41 = vld [vmem:[%s2261_s1 + $0x80] sm:$0xff] }
  0x23   : > { %403 = vrot.lane.b32.xlu0 %v399_v2, %s1496_s15  ;;  %529 = vmatpush.msra.mxu2 %v464_v15  ;;  %v1277_v40 = vld [vmem:[%s2261_s1 + $0xc8] sm:$0xff]  ;;  %v1276_v42 = vld [vmem:[%s2261_s1 + $0xc0] sm:$0xff]  ;;  %v1263_v43 = vld [vmem:[%s2261_s1 + $0x78] sm:$0xff]  ;;  %s1191_s15 = scalar_lea.hbm %s2254_s11, %s1579_s21  ;;  %s1451_s21 = scalar_lea.hbm %s2254_s11, 2 }
  0x24   : > { %569 = vmatpush.msra.mxu3 %v1282_v18  ;;  %v1262_v44 = vld [vmem:[%s2261_s1 + $0x70] sm:$0xff]  ;;  %v1261_v45 = vld [vmem:[%s2261_s1 + $0x68] sm:$0xff]  ;;  %v1260_v46 = vld [vmem:[%s2261_s1 + $0x60] sm:$0xff]  ;;  %s1195_s24 = sshll.u32 %s1191_s15, 4  ;;  %s1196_s24 = int_to_ptr.hbm [resolvable:$true] %s1195_s24 }
  0x25   : > { %530 = vmatpush.msra.mxu2 %v463_v17  ;;  %v619_v55 = vld [vmem:[%s2247_s4 + $0x78] sm:$0xff]  ;;  %v618_v56 = vld [vmem:[%s2247_s4 + $0x70] sm:$0xff]  ;;  %v617_v60 = vld [vmem:[%s2247_s4 + $0x68] sm:$0xff]  ;;  %s1445_s25 = sshra.s32 %s1196_s24, 4  ;;  %s1446_s25 = int_to_ptr.hbm [resolvable:$true] %s1445_s25 }
  0x26   : > { %570 = vmatpush.msra.mxu3 %v1281_v32  ;;  %v1305_v57 = vld [vmem:[%s2247_s4 + $0x118] sm:$0xff]  ;;  %v1304_v59 = vld [vmem:[%s2247_s4 + $0x110] sm:$0xff]  ;;  %v1303_v62 = vld [vmem:[%s2247_s4 + $0x108] sm:$0xff]  ;;  %s1447_s30 = scalar_lea.hbm %s1446_s25, 1  ;;  %p1452_p0 = scmp.lt.s32.totalorder %s1446_s25, %s2254_s11 }
  0x27   : > { %531 = vmatpush.msra.mxu2 %v462_v20  ;;  %662 = vmatpush.msra.mxu0 %v1305_v57  ;;  %v1309_v58 = vld [vmem:[%s2247_s4 + $0x138] sm:$0xff]  ;;  %v1308_v61 = vld [vmem:[%s2247_s4 + $0x130] sm:$0xff]  ;;  %v1307_v63 = vld [vmem:[%s2247_s4 + $0x128] sm:$0xff]  ;;  %p1448_p11 = scmp.ne.s32.totalorder %s1446_s25, %s1447_s30  ;;  %p1453_p1 = scmp.lt.s32.totalorder %s1451_s21, %s1447_s30 }
  0x28   : > { %571 = vmatpush.msra.mxu3 %v1280_v34  ;;  %v616_v1 = vld [vmem:[%s2247_s4 + $0x60] sm:$0xff]  ;;  %v615_v4 = vld [vmem:[%s2247_s4 + $0x58] sm:$0xff]  ;;  %v614_v6 = vld [vmem:[%s2247_s4 + $0x50] sm:$0xff] }
  0x29   : > { %532 = vmatpush.msra.mxu2 %v461_v23  ;;  %663 = vmatpush.msra.mxu0 %v1304_v59  ;;  %v1302_v2 = vld [vmem:[%s2247_s4 + $0x100] sm:$0xff]  ;;  %v1301_v5 = vld [vmem:[%s2247_s4 + $0xf8] sm:$0xff]  ;;  %v1300_v7 = vld [vmem:[%s2247_s4 + $0xf0] sm:$0xff]  ;;  %p1449_p12 = pnand %p1448_p11, %p1596_p5  ;;  %p1454_p2 = por %p1453_p1, %p1452_p0 }
  0x2a   : > { %572 = vmatpush.msra.mxu3 %v1279_v36  ;;  %v1327_v0 = vld [vmem:[%s2247_s4 + $0x1b8] sm:$0xff]  ;;  %v1326_v8 = vld [vmem:[%s2247_s4 + $0x1b0] sm:$0xff]  ;;  %v1325_v11 = vld [vmem:[%s2247_s4 + $0x1a8] sm:$0xff] }
  0x2b   : > { %533 = vmatpush.msra.mxu2 %v460_v25  ;;  %664 = vmatpush.msra.mxu0 %v1303_v62  ;;  %v612_v12 = vld [vmem:[%s2247_s4 + $0x40] sm:$0xff]  ;;  %v611_v15 = vld [vmem:[%s2247_s4 + $0x38] sm:$0xff]  ;;  %v610_v18 = vld [vmem:[%s2247_s4 + $0x30] sm:$0xff]  ;;  %p1450_p13 = pneg %p1449_p12 }
  0x2c   : > { %573 = vmatpush.msra.mxu3 %v1278_v38  ;;  %v1298_v13 = vld [vmem:[%s2247_s4 + $0xe0] sm:$0xff]  ;;  %v1297_v16 = vld [vmem:[%s2247_s4 + $0xd8] sm:$0xff]  ;;  %v1322_v20 = vld [vmem:[%s2247_s4 + $0x190] sm:$0xff] }
  0x2d   : > { %534 = vmatpush.msra.mxu2 %v459_v27  ;;  %665 = vmatpush.msra.mxu0 %v1302_v2  ;;  %v1324_v14 = vld [vmem:[%s2247_s4 + $0x1a0] sm:$0xff]  ;;  %v1323_v17 = vld [vmem:[%s2247_s4 + $0x198] sm:$0xff]  ;;  %v1321_v34 = vld [vmem:[%s2247_s4 + $0x188] sm:$0xff]  ;;  %p1455_p3 = pnand %p1454_p2, %p1450_p13 }
  0x2e   : > { %574 = vmatpush.msra.mxu3 %v1277_v40  ;;  %v623_v36 = vld [vmem:[%s2247_s4 + $0x98] sm:$0xff]  ;;  %v1320_v38 = vld [vmem:[%s2247_s4 + $0x180] sm:$0xff]  ;;  %v622_v40 = vld [vmem:[%s2247_s4 + $0x90] sm:$0xff] }
  0x2f   : > { %535 = vmatpush.msra.mxu2 %v458_v30  ;;  %666 = vmatpush.msra.mxu0 %v1301_v5  ;;  %v1314_v57 = vld [vmem:[%s2247_s4 + $0x150] sm:$0xff]  ;;  %v1313_v59 = vld [vmem:[%s2247_s4 + $0x148] sm:$0xff] }
  0x30   : > { %575 = vmatpush.msra.mxu3 %v1276_v42  ;;  %v1319_v42 = vld [vmem:[%s2247_s4 + $0x178] sm:$0xff] }
  0x31   : > { %705 = vmatpush.msrb.mxu2 %v619_v55  ;;  %667 = vmatpush.msra.mxu0 %v1300_v7  ;;  %v1315_v55 = vld [vmem:[%s2247_s4 + $0x158] sm:$0xff] }
  0x32   : > { %737 = vmatpush.msrb.mxu3 %v623_v36  ;;  %v1352_v36 = vld [vmem:[%s2248_s5 + $0x108] sm:$0xff] }
  0x33   : > { %706 = vmatpush.msrb.mxu2 %v618_v56  ;;  %v1329_v56 = vld [vmem:[%s2247_s4 + $0x1c8] sm:$0xff] }
  0x34   : > { %738 = vmatpush.msrb.mxu3 %v622_v40 }
  0x35   : > { %707 = vmatpush.msrb.mxu2 %v617_v60  ;;  %v1312_v60 = vld [vmem:[%s2247_s4 + $0x140] sm:$0xff] }
  0x37   : > { %708 = vmatpush.msrb.mxu2 %v616_v1 }
  0x39   : > { %709 = vmatpush.msrb.mxu2 %v615_v4 }
  0x3b   : > { %710 = vmatpush.msrb.mxu2 %v614_v6 }
  0x8d   : > { %v406_v3 = vpop.permute.xlu0 %405 }
  0x8e   : > { %411 = vst.msk [vmem:[#allocation2 + $0x9] sm:$0xff] %vm409_vm2, %v406_v3  ;;  %v1306_v3 = vld [vmem:[%s2247_s4 + $0x120] sm:$0xff] }
  0x95   : > { %v404_v9 = vpop.permute.xlu0 %403  ;;  %v417_v10 = vld [vmem:[#allocation2 + $0x10] sm:$0x3] }
  0x96   : > { %410 = vst.msk [vmem:[#allocation2 + $0x1] sm:$0xff] %vm409_vm2, %v404_v9  ;;  %1256 = vmatpush.msk.msra.mxu1 %vm428_vm3, %v417_v10  ;;  %v613_v9 = vld [vmem:[%s2247_s4 + $0x48] sm:$0xff]  ;;  %vm1156_vm2 = vcmask 130048  }
  0x97   : > { %v1299_v10 = vld [vmem:[%s2247_s4 + $0xe8] sm:$0xff]  ;;  %711 = vmatpush.msrb.mxu2 %v613_v9 }
  0x98   : > { %668 = vmatpush.msra.mxu0 %v1299_v10 }
  0x99   : > { %712 = vmatpush.msrb.mxu2 %v612_v12 }
  0x9a   : > { %669 = vmatpush.msra.mxu0 %v1298_v13 }
  0x9b   : > { %713 = vmatpush.msrb.mxu2 %v611_v15 }
  0x9c   : > { %670 = vmatpush.msra.mxu0 %v1297_v16 }
  0x9d   : > { %v416_v19 = vld [vmem:[#allocation2 + $0x8] sm:$0xff]  ;;  %v415_v22 = vld [vmem:[#allocation2] sm:$0xff]  ;;  %714 = vmatpush.msrb.mxu2 %v610_v18 }
  0x9e   : > { %446 = vmatpush.msra.mxu1 %v416_v19  ;;  %v1296_v19 = vld [vmem:[%s2247_s4 + $0xd0] sm:$0xff] }
  0x9f   : > { %671 = vmatpush.msra.mxu0 %v1296_v19 }
  0xa0   : > { %447 = vmatpush.msra.mxu1 %v415_v22 }
  0xa1   : > { %1257 = vmatmul.msk.f32.vlgmr.msra.gmra.mxu1 %vm418_vm4, %v412_v21  ;;  %v609_v21 = vld [vmem:[%s2247_s4 + $0x28] sm:$0xff] }
  0xa2   : > { %1272 = vmatpush.msk.msrb.mxu1 %vm428_vm3, %v1271_v24  ;;  %v608_v24 = vld [vmem:[%s2247_s4 + $0x20] sm:$0xff]  ;;  %715 = vmatpush.msrb.mxu2 %v609_v21 }
  0xa4   : > { %499 = vmatpush.msrb.mxu1 %v1270_v26  ;;  %v1428_v26 = vld [vmem:[%s2246_s3] ss:$0 sm:$0xff]  ;;  %716 = vmatpush.msrb.mxu2 %v608_v24 }
  0xa6   : > { %500 = vmatpush.msrb.mxu1 %v1269_v31 }
  0xa8   : > { %501 = vmatpush.msrb.mxu1 %v1268_v33  ;;  %v1295_v33 = vld [vmem:[%s2247_s4 + $0xc8] sm:$0xff] }
  0xa9   : > { %1258 = vmatmul.msk.f32.gmra.mxu1 %vm418_vm4, %v413_v28  ;;  %672 = vmatpush.msra.mxu0 %v1295_v33 }
  0xaa   : > { %502 = vmatpush.msrb.mxu1 %v1267_v35  ;;  %v607_v35 = vld [vmem:[%s2247_s4 + $0x18] sm:$0xff] }
  0xab   : > { %717 = vmatpush.msrb.mxu2 %v607_v35  ;;  %v1353_v35 = vld [vmem:[%s2248_s5 + $0x110] sm:$0xff] }
  0xac   : > { %503 = vmatpush.msrb.mxu1 %v1266_v37  ;;  %v1294_v37 = vld [vmem:[%s2247_s4 + $0xc0] sm:$0xff] }
  0xad   : > { %673 = vmatpush.msra.mxu0 %v1294_v37 }
  0xae   : > { %504 = vmatpush.msrb.mxu1 %v1265_v39  ;;  %v606_v39 = vld [vmem:[%s2247_s4 + $0x10] sm:$0xff] }
  0xaf   : > { %718 = vmatpush.msrb.mxu2 %v606_v39  ;;  %v1351_v39 = vld [vmem:[%s2248_s5 + $0x100] sm:$0xff] }
  0xb0   : > { %505 = vmatpush.msrb.mxu1 %v1264_v41  ;;  %v1293_v41 = vld [vmem:[%s2247_s4 + $0xb8] sm:$0xff] }
  0xb1   : > { %1259 = vmatmul.msk.f32.gmra.mxu1 %vm418_vm4, %v414_v29  ;;  %674 = vmatpush.msra.mxu0 %v1293_v41  ;;  %v1350_v41 = vld [vmem:[%s2248_s5 + $0xf8] sm:$0xff] }
  0xb2   : > { %506 = vmatpush.msrb.mxu1 %v1263_v43  ;;  %v605_v43 = vld [vmem:[%s2247_s4 + $0x8] sm:$0xff] }
  0xb3   : > { %719 = vmatpush.msrb.mxu2 %v605_v43  ;;  %v1358_v43 = vld [vmem:[%s2248_s5 + $0x138] sm:$0xff] }
  0xb4   : > { %507 = vmatpush.msrb.mxu1 %v1262_v44  ;;  %v621_v44 = vld [vmem:[%s2247_s4 + $0x88] sm:$0xff] }
  0xb5   : > { %739 = vmatpush.msrb.mxu3 %v621_v44  ;;  %v915_v44 = vld [vmem:[%s2248_s5 + $0x78] sm:$0xff] }
  0xb6   : > { %508 = vmatpush.msrb.mxu1 %v1261_v45  ;;  %v1292_v45 = vld [vmem:[%s2247_s4 + $0xb0] sm:$0xff] }
  0xb7   : > { %675 = vmatpush.msra.mxu0 %v1292_v45  ;;  %v1349_v45 = vld [vmem:[%s2248_s5 + $0xf0] sm:$0xff] }
  0xb8   : > { %509 = vmatpush.msrb.mxu1 %v1260_v46  ;;  %v1318_v46 = vld [vmem:[%s2247_s4 + $0x170] sm:$0xff] }
  0xba   : > { %694 = vmatpush.msra.mxu1 %v1309_v58  ;;  %v1328_v58 = vld [vmem:[%s2247_s4 + $0x1c0] sm:$0xff] }
  0xbc   : > { %695 = vmatpush.msra.mxu1 %v1308_v61 }
  0xbe   : > { %696 = vmatpush.msra.mxu1 %v1307_v63 }
  0xc0   : > { %697 = vmatpush.msra.mxu1 %v1306_v3 }
 0x11e   : > { %v449_v47 = vpop.f32.mrf.mxu1 }
 0x11f   : > { %1275 = vmatmul.msk.f32.vlgmr.msra.gmra.mxu2 %vm384_vm0, %v449_v47  ;;  %v553_v49 = vrot.slane %v449_v47, 1  ;;  %v604_v47 = vld [vmem:[%s2247_s4] sm:$0xff] }
 0x120   : > { %720 = vmatpush.msrb.mxu2 %v604_v47  ;;  %v914_v47 = vld [vmem:[%s2248_s5 + $0x70] sm:$0xff] }
 0x122   : > { %987 = vmatpush.msra.mxu2 %v1358_v43 }
 0x126   : > { %v452_v48 = vpop.f32.mrf.mxu1 }
 0x127   : > { %v486_v50 = vrot.slane %v452_v48, 1  ;;  %v620_v48 = vld [vmem:[%s2247_s4 + $0x80] sm:$0xff] }
 0x128   : > { %740 = vmatpush.msrb.mxu3 %v620_v48  ;;  %v1348_v48 = vld [vmem:[%s2248_s5 + $0xe8] sm:$0xff] }
 0x129   : > { %v554_v51 = vsel %vm485_vm5, %v553_v49, %v486_v50  ;;  %v1291_v49 = vld [vmem:[%s2247_s4 + $0xa8] sm:$0xff] }
 0x12a   : > { %1289 = vmatmul.msk.f32.vlgmr.msra.gmra.mxu3 %vm384_vm0, %v554_v51  ;;  %v1331_v51 = vld [vmem:[%s2247_s4 + $0x1d8] sm:$0xff]  ;;  %676 = vmatpush.msra.mxu0 %v1291_v49  ;;  %v836_v49 = vld [vmem:[%s2249_s6 + $0x8] sm:$0x1] }
 0x12b   : > { %816 = vmatpush.msra.mxu3 %v1331_v51  ;;  %v913_v51 = vld [vmem:[%s2248_s5 + $0x68] sm:$0xff] }
 0x12e   : > { %v455_v52 = vpop.f32.mrf.mxu1 }
 0x12f   : > { %v487_v53 = vrot.slane %v455_v52, 1  ;;  %v1290_v52 = vld [vmem:[%s2247_s4 + $0xa0] sm:$0xff] }
 0x130   : > { %677 = vmatpush.msra.mxu0 %v1290_v52  ;;  %v1346_v52 = vld [vmem:[%s2248_s5 + $0xd8] sm:$0xff] }
 0x131   : > { %v488_v54 = vsel %vm485_vm5, %v486_v50, %v487_v53  ;;  %v1317_v50 = vld [vmem:[%s2247_s4 + $0x168] sm:$0xff]  ;;  %v1316_v53 = vld [vmem:[%s2247_s4 + $0x160] sm:$0xff] }
 0x132   : > { %1273 = vmatmul.msk.f32.vlgmr.msrb.gmra.mxu1 %vm384_vm0, %v488_v54  ;;  %v1330_v54 = vld [vmem:[%s2247_s4 + $0x1d0] sm:$0xff]  ;;  %vm1105_vm0 = vcmask 1043456  }
 0x133   : > { %784 = vmatpush.msrb.mxu1 %v1327_v0  ;;  %817 = vmatpush.msra.mxu3 %v1330_v54  ;;  %v1345_v54 = vld [vmem:[%s2248_s5 + $0xd0] sm:$0xff] }
 0x135   : > { %785 = vmatpush.msrb.mxu1 %v1326_v8  ;;  %818 = vmatpush.msra.mxu3 %v1329_v56  ;;  %v910_v56 = vld [vmem:[%s2248_s5 + $0x50] sm:$0xff] }
 0x137   : > { %786 = vmatpush.msrb.mxu1 %v1325_v11  ;;  %819 = vmatpush.msra.mxu3 %v1328_v58  ;;  %v908_v58 = vld [vmem:[%s2248_s5 + $0x40] sm:$0xff] }
 0x139   : > { %787 = vmatpush.msrb.mxu1 %v1324_v14 }
 0x13b   : > { %788 = vmatpush.msrb.mxu1 %v1323_v17 }
 0x13d   : > { %789 = vmatpush.msrb.mxu1 %v1322_v20 }
 0x13f   : > { %790 = vmatpush.msrb.mxu1 %v1321_v34  ;;  %v1354_v34 = vld [vmem:[%s2248_s5 + $0x118] sm:$0xff] }
 0x140   : > { %955 = vmatpush.msrb.mxu0 %v1354_v34  ;;  %v1362_v34 = vld [vmem:[%s2248_s5 + $0x148] sm:$0xff] }
 0x141   : > { %791 = vmatpush.msrb.mxu1 %v1320_v38  ;;  %v835_v38 = vld [vmem:[%s2249_s6] sm:$0xff] }
 0x142   : > { %956 = vmatpush.msrb.mxu0 %v1353_v35 }
 0x143   : > { %792 = vmatpush.msrb.mxu1 %v1319_v42 }
 0x144   : > { %957 = vmatpush.msrb.mxu0 %v1352_v36  ;;  %v1361_v36 = vld [vmem:[%s2248_s5 + $0x140] sm:$0xff] }
 0x145   : > { %793 = vmatpush.msrb.mxu1 %v1318_v46 }
 0x146   : > { %958 = vmatpush.msrb.mxu0 %v1351_v39 }
 0x147   : > { %794 = vmatpush.msrb.mxu1 %v1317_v50  ;;  %v1347_v50 = vld [vmem:[%s2248_s5 + $0xe0] sm:$0xff] }
 0x148   : > { %959 = vmatpush.msrb.mxu0 %v1350_v41 }
 0x149   : > { %795 = vmatpush.msrb.mxu1 %v1316_v53  ;;  %v912_v53 = vld [vmem:[%s2248_s5 + $0x60] sm:$0xff] }
 0x14a   : > { %960 = vmatpush.msrb.mxu0 %v1349_v45 }
 0x14b   : > { %796 = vmatpush.msrb.mxu1 %v1315_v55  ;;  %v911_v55 = vld [vmem:[%s2248_s5 + $0x58] sm:$0xff] }
 0x14c   : > { %961 = vmatpush.msrb.mxu0 %v1348_v48  ;;  %v1128_v48 = vld [vmem:[%s2250_s7 + $0x78] sm:$0xff] }
 0x14d   : > { %797 = vmatpush.msrb.mxu1 %v1314_v57  ;;  %v909_v57 = vld [vmem:[%s2248_s5 + $0x48] sm:$0xff] }
 0x14e   : > { %962 = vmatpush.msrb.mxu0 %v1347_v50  ;;  %v1126_v50 = vld [vmem:[%s2250_s7 + $0x68] sm:$0xff] }
 0x14f   : > { %798 = vmatpush.msrb.mxu1 %v1313_v59  ;;  %v907_v59 = vld [vmem:[%s2248_s5 + $0x38] sm:$0xff] }
 0x150   : > { %963 = vmatpush.msrb.mxu0 %v1346_v52  ;;  %v1124_v52 = vld [vmem:[%s2250_s7 + $0x58] sm:$0xff] }
 0x151   : > { %799 = vmatpush.msrb.mxu1 %v1312_v60  ;;  %v906_v60 = vld [vmem:[%s2248_s5 + $0x30] sm:$0xff] }
 0x152   : > { %964 = vmatpush.msrb.mxu0 %v1345_v54  ;;  %v1122_v54 = vld [vmem:[%s2250_s7 + $0x48] sm:$0xff] }
 0x1a2   : > { %v537_v22 = vpop.f32.mrf.mxu2 }
 0x1ad   : > { %v577_v27 = vpop.f32.mrf.mxu3 }
 0x1af   : > { %v511_v23 = vpop.f32.mrf.mxu1 }
 0x1b0   : > { %v538_v25 = vadd.f32 %v537_v22, %v511_v23 }
 0x1b2   : > { %v580_v28 = vadd.f32 %v577_v27, %v538_v25 }
 0x1b4   : > { %v585_v29 = vadd.f32 %v1428_v26, %v580_v28 }
 0x1b6   : > { %vm586_vm8 = vcmp.gt.f32.partialorder %v585_v29, 0.0  ;;  %v587_v30 = vmul.f32 0.2, %v585_v29 }
 0x1b8   : > { %v588_v31 = vsel %vm586_vm8, %v585_v29, %v587_v30 }
 0x1b9   : > { %v590_v32 = vrot.slane %v588_v31, 7 }
 0x1bb   : > { %591 = vrot.lane.b32.xlu1 %v590_v32, %s2255_s29  ;;  %s1183_s29 = scalar_lea.sflag [#allocation6], %s377_s12 }
 0x22d   : > { %v592_v61 = vpop.permute.xlu1 %591 }
 0x22e   : > { %595 = vst.msk [vmem:[#allocation3] sm:$0xfe] %vm594_vm9, %v592_v61 }
 0x22f   : > { %597 = vst.msk [vmem:[#allocation3 + $0x8] sm:$0xfe] %vm596_vm10, %v592_v61 }
 0x230   : > { %599 = vst.msk [vmem:[#allocation3 + $0x10] sm:$0x1] %vm598_vm11, %v592_v61 }
 0x231   : > { %601 = vst.msk [vmem:[#allocation3 + $0x18] sm:$0x1] %vm600_vm12, %v592_v61  ;;  %v905_v61 = vld [vmem:[%s2248_s5 + $0x28] sm:$0xff] }
 0x235   : > { %v602_v62 = vld [vmem:[#allocation3] sm:$0xff] }
 0x236   : > { %v624_v63 = vld [vmem:[#allocation3] sm:$0xfe]  ;;  %721 = vmatmul.f32.vlgmr.msrb.gmra.mxu2 %v602_v62  ;;  %v603_v1 = vld [vmem:[#allocation3 + $0x8] sm:$0xff] }
 0x237   : > { %v653_v2 = vrot.slane %v624_v63, 1  ;;  %v625_v3 = vld [vmem:[#allocation3 + $0x8] sm:$0xfe]  ;;  %1311 = vmatmul.msk.f32.vlgmr.msrb.gmra.mxu3 %vm390_vm6, %v603_v1  ;;  %v626_v4 = vld [vmem:[#allocation3 + $0x10] sm:$0x1]  ;;  %v903_v63 = vld [vmem:[%s2248_s5 + $0x18] sm:$0xff] }
 0x238   : > { %v656_v5 = vrot.slane %v625_v3, 1  ;;  %v746_v0 = vld [vmem:[#allocation3 + $0x8] sm:$0xfc]  ;;  %v654_v6 = vrot.slane %v626_v4, 1  ;;  %v627_v7 = vld [vmem:[#allocation3 + $0x18] sm:$0x1] }
 0x239   : > { %v748_v8 = vld [vmem:[#allocation3 + $0x18] sm:$0x3]  ;;  %v657_v9 = vrot.slane %v627_v7, 1  ;;  %v778_v11 = vrot.slane %v746_v0, 2  ;;  %v745_v14 = vld [vmem:[#allocation3] sm:$0xfc] }
 0x23a   : > { %v655_v10 = vsel %vm485_vm5, %v653_v2, %v654_v6  ;;  %v779_v12 = vrot.slane %v748_v8, 2  ;;  %v747_v15 = vld [vmem:[#allocation3 + $0x10] sm:$0x3]  ;;  %v775_v17 = vrot.slane %v745_v14, 2  ;;  %v904_v62 = vld [vmem:[%s2248_s5 + $0x20] sm:$0xff]  ;;  %v902_v1 = vld [vmem:[%s2248_s5 + $0x10] sm:$0xff] }
 0x23b   : > { %678 = vmatmul.f32.vlgmr.msra.gmra.mxu0 %v655_v10  ;;  %v658_v13 = vsel %vm485_vm5, %v656_v5, %v657_v9  ;;  %v776_v18 = vrot.slane %v747_v15, 2  ;;  %v901_v2 = vld [vmem:[%s2248_s5 + $0x8] sm:$0xff]  ;;  %v1357_v3 = vld [vmem:[%s2248_s5 + $0x130] sm:$0xff]  ;;  %v900_v4 = vld [vmem:[%s2248_s5] sm:$0xff] }
 0x23c   : > { %1310 = vmatmul.msk.f32.vlgmr.msra.gmra.mxu1 %vm390_vm6, %v658_v13  ;;  %v780_v16 = vsel %vm774_vm13, %v778_v11, %v779_v12  ;;  %988 = vmatpush.msra.mxu2 %v1357_v3  ;;  %v1344_v5 = vld [vmem:[%s2248_s5 + $0xc8] sm:$0xff]  ;;  %v1343_v6 = vld [vmem:[%s2248_s5 + $0xc0] sm:$0xff]  ;;  %v1342_v8 = vld [vmem:[%s2248_s5 + $0xb8] sm:$0xff] }
 0x23d   : > { %v777_v19 = vsel %vm774_vm13, %v775_v17, %v776_v18  ;;  %v1356_v0 = vld [vmem:[%s2248_s5 + $0x128] sm:$0xff]  ;;  %965 = vmatpush.msrb.mxu0 %v1344_v5  ;;  %v1355_v7 = vld [vmem:[%s2248_s5 + $0x120] sm:$0xff]  ;;  %v1376_v9 = vld [vmem:[%s2248_s5 + $0x1b8] sm:$0xff] }
 0x23e   : > { %989 = vmatpush.msra.mxu2 %v1356_v0  ;;  %v1341_v10 = vld [vmem:[%s2248_s5 + $0xb0] sm:$0xff]  ;;  %v1340_v12 = vld [vmem:[%s2248_s5 + $0xa8] sm:$0xff]  ;;  %v919_v14 = vld [vmem:[%s2248_s5 + $0x98] sm:$0xff] }
 0x23f   : > { %1332 = vmatmul.msk.f32.vlgmr.msra.gmra.mxu3 %vm390_vm6, %v780_v16  ;;  %966 = vmatpush.msrb.mxu0 %v1343_v6  ;;  %v1375_v11 = vld [vmem:[%s2248_s5 + $0x1b0] sm:$0xff]  ;;  %v1374_v13 = vld [vmem:[%s2248_s5 + $0x1a8] sm:$0xff]  ;;  %v1339_v15 = vld [vmem:[%s2248_s5 + $0xa0] sm:$0xff] }
 0x240   : > { %990 = vmatpush.msra.mxu2 %v1355_v7  ;;  %v1373_v16 = vld [vmem:[%s2248_s5 + $0x1a0] sm:$0xff]  ;;  %1029 = vmatpush.msra.mxu1 %v919_v14  ;;  %v918_v17 = vld [vmem:[%s2248_s5 + $0x90] sm:$0xff]  ;;  %v1372_v18 = vld [vmem:[%s2248_s5 + $0x198] sm:$0xff] }
 0x241   : > { %967 = vmatpush.msrb.mxu0 %v1342_v8 }
 0x242   : > { %1063 = vmatpush.msrb.mxu2 %v1376_v9  ;;  %1030 = vmatpush.msra.mxu1 %v918_v17 }
 0x243   : > { %968 = vmatpush.msrb.mxu0 %v1341_v10 }
 0x244   : > { %800 = vmatmul.f32.vlgmr.msrb.gmra.mxu1 %v777_v19  ;;  %1064 = vmatpush.msrb.mxu2 %v1375_v11  ;;  %v917_v19 = vld [vmem:[%s2248_s5 + $0x88] sm:$0xff] }
 0x245   : > { %969 = vmatpush.msrb.mxu0 %v1340_v12  ;;  %1031 = vmatpush.msra.mxu1 %v917_v19  ;;  %v1154_v19 = vld [vmem:[%s2252_s9 + $0x8] sm:$0xff] }
 0x246   : > { %1065 = vmatpush.msrb.mxu2 %v1374_v13 }
 0x247   : > { %970 = vmatpush.msrb.mxu0 %v1339_v15 }
 0x248   : > { %1066 = vmatpush.msrb.mxu2 %v1373_v16 }
 0x249   : > { %1130 = vmatpush.msra.mxu0 %v1128_v48 }
 0x24a   : > { %1067 = vmatpush.msrb.mxu2 %v1372_v18 }
 0x2b8   : > { %v679_v20 = vpop.f32.mrf.mxu0 }
 0x2b9   : > { %v699_v21 = vpop.f32.mrf.mxu1  ;;  %v722_v24 = vpop.f32.mrf.mxu2 }
 0x2ba   : > { %v742_v22 = vpop.f32.mrf.mxu3  ;;  %v700_v23 = vadd.f32 %v699_v21, %v679_v20  ;;  %v1371_v20 = vld [vmem:[%s2248_s5 + $0x190] sm:$0xff]  ;;  %v916_v21 = vld [vmem:[%s2248_s5 + $0x80] sm:$0xff] }
 0x2bb   : > { %1068 = vmatpush.msrb.mxu2 %v1371_v20  ;;  %1032 = vmatpush.msra.mxu1 %v916_v21  ;;  %v1153_v20 = vld [vmem:[%s2252_s9] sm:$0xff] }
 0x2bc   : > { %v723_v25 = vadd.f32 %v722_v24, %v700_v23  ;;  %v1380_v23 = vld [vmem:[%s2248_s5 + $0x1d8] sm:$0xff]  ;;  %v1369_v24 = vld [vmem:[%s2248_s5 + $0x180] sm:$0xff] }
 0x2bd   : > { %1095 = vmatpush.msrb.mxu1 %v1380_v23  ;;  %v1129_v21 = vld [vmem:[%s2251_s8] sm:$0x1] }
 0x2be   : > { %v743_v28 = vadd.f32 %v742_v22, %v723_v25  ;;  %v1370_v22 = vld [vmem:[%s2248_s5 + $0x188] sm:$0xff]  ;;  %v1379_v25 = vld [vmem:[%s2248_s5 + $0x1d0] sm:$0xff] }
 0x2bf   : > { %1069 = vmatpush.msrb.mxu2 %v1370_v22  ;;  %1096 = vmatpush.msrb.mxu1 %v1379_v25 }
 0x2c1   : > { %v801_v26 = vpop.f32.mrf.mxu1  ;;  %1070 = vmatpush.msrb.mxu2 %v1369_v24 }
 0x2c2   : > { %v821_v27 = vpop.f32.mrf.mxu3 }
 0x2c3   : > { %v822_v29 = vadd.f32 %v821_v27, %v801_v26  ;;  %v1368_v26 = vld [vmem:[%s2248_s5 + $0x178] sm:$0xff]  ;;  %v1378_v27 = vld [vmem:[%s2248_s5 + $0x1c8] sm:$0xff] }
 0x2c4   : > { %1071 = vmatpush.msrb.mxu2 %v1368_v26  ;;  %1097 = vmatpush.msrb.mxu1 %v1378_v27  ;;  %v1155_v26 = vld [vmem:[%s2253_s10] sm:$0x1] }
 0x2c5   : > { %v824_v30 = vadd.f32 %v822_v29, %v743_v28  ;;  %v1367_v28 = vld [vmem:[%s2248_s5 + $0x170] sm:$0xff]  ;;  %v1377_v29 = vld [vmem:[%s2248_s5 + $0x1c0] sm:$0xff] }
 0x2c6   : > { %1072 = vmatpush.msrb.mxu2 %v1367_v28  ;;  %1098 = vmatpush.msrb.mxu1 %v1377_v29 }
 0x2c7   : > { %v825_v31 = vmax.f32 %v824_v30, 0.0  ;;  %v1366_v30 = vld [vmem:[%s2248_s5 + $0x168] sm:$0xff] }
 0x2c8   : > { %1073 = vmatpush.msrb.mxu2 %v1366_v30 }
 0x2c9   : > { %v827_v32 = vrot.slane %v825_v31, 7  ;;  %v1365_v31 = vld [vmem:[%s2248_s5 + $0x160] sm:$0xff] }
 0x2ca   : > { %1074 = vmatpush.msrb.mxu2 %v1365_v31 }
 0x2cb   : > { %828 = vrot.lane.b32.xlu1 %v827_v32, %s2262_s22  ;;  %v1364_v32 = vld [vmem:[%s2248_s5 + $0x158] sm:$0xff]  ;;  %s1193_s22 = sshll.u32 %s378_s16, 4  ;;  %s1194_s22 = int_to_ptr.vmem [resolvable:$true] %s1193_s22 }
 0x2cc   : > { %1075 = vmatpush.msrb.mxu2 %v1364_v32 }
 0x33d   : > { %v829_v33 = vpop.permute.xlu1 %828 }
 0x33e   : > { %831 = vst.msk [vmem:[#allocation4] sm:$0xfe] %vm594_vm9, %v829_v33 }
 0x33f   : > { %832 = vst.msk [vmem:[#allocation4 + $0x8] sm:$0xfe] %vm596_vm10, %v829_v33 }
 0x340   : > { %833 = vst.msk [vmem:[#allocation4 + $0x10] sm:$0x1] %vm598_vm11, %v829_v33 }
 0x341   : > { %834 = vst.msk [vmem:[#allocation4 + $0x18] sm:$0x1] %vm600_vm12, %v829_v33  ;;  %v1363_v33 = vld [vmem:[%s2248_s5 + $0x150] sm:$0xff] }
 0x342   : > { %1076 = vmatpush.msrb.mxu2 %v1363_v33 }
 0x344   : > { %1077 = vmatpush.msrb.mxu2 %v1362_v34 }
 0x345   : > { %v837_v40 = vld [vmem:[#allocation4] sm:$0xff] }
 0x346   : > { %v838_v46 = vld [vmem:[#allocation4 + $0x8] sm:$0xff]  ;;  %1078 = vmatpush.msrb.mxu2 %v1361_v36 }
 0x347   : > { %v839_v37 = vld [vmem:[#allocation4 + $0x10] sm:$0x3] }
 0x348   : > { %1333 = vmatpush.msk.msrb.mxu3 %vm428_vm3, %v839_v37  ;;  %v840_v42 = vld [vmem:[#allocation4 + $0x18] sm:$0x3] }
 0x34a   : > { %869 = vmatpush.msrb.mxu3 %v837_v40 }
 0x34b   : > { %1334 = vmatmul.msk.f32.vlgmr.msrb.gmra.mxu3 %vm841_vm14, %v835_v38 }
 0x34c   : > { %1336 = vmatpush.msk.msra.mxu3 %vm428_vm3, %v840_v42 }
 0x34e   : > { %892 = vmatpush.msra.mxu3 %v838_v46 }
 0x350   : > { %997 = vmatpush.msrb.mxu3 %v915_v44 }
 0x352   : > { %998 = vmatpush.msrb.mxu3 %v914_v47 }
 0x353   : > { %1335 = vmatmul.msk.f32.gmra.mxu3 %vm841_vm14, %v836_v49 }
 0x354   : > { %999 = vmatpush.msrb.mxu3 %v913_v51  ;;  %v1125_v51 = vld [vmem:[%s2250_s7 + $0x60] sm:$0xff] }
 0x356   : > { %1000 = vmatpush.msrb.mxu3 %v912_v53  ;;  %v1123_v53 = vld [vmem:[%s2250_s7 + $0x50] sm:$0xff] }
 0x358   : > { %1001 = vmatpush.msrb.mxu3 %v911_v55  ;;  %v1121_v55 = vld [vmem:[%s2250_s7 + $0x40] sm:$0xff] }
 0x35a   : > { %1002 = vmatpush.msrb.mxu3 %v910_v56  ;;  %v1120_v56 = vld [vmem:[%s2250_s7 + $0x38] sm:$0xff] }
 0x35b   : > { %1337 = vmatmul.msk.f32.vlgmr.msra.gmra.mxu3 %vm841_vm14, %v835_v38 }
 0x35c   : > { %1003 = vmatpush.msrb.mxu3 %v909_v57  ;;  %v1119_v57 = vld [vmem:[%s2250_s7 + $0x30] sm:$0xff] }
 0x35e   : > { %1004 = vmatpush.msrb.mxu3 %v908_v58  ;;  %v1118_v58 = vld [vmem:[%s2250_s7 + $0x28] sm:$0xff] }
 0x360   : > { %1005 = vmatpush.msrb.mxu3 %v907_v59  ;;  %v1117_v59 = vld [vmem:[%s2250_s7 + $0x20] sm:$0xff] }
 0x362   : > { %1006 = vmatpush.msrb.mxu3 %v906_v60  ;;  %v1116_v60 = vld [vmem:[%s2250_s7 + $0x18] sm:$0xff] }
 0x363   : > { %1338 = vmatmul.msk.f32.gmra.mxu3 %vm841_vm14, %v836_v49  ;;  %v1127_v49 = vld [vmem:[%s2250_s7 + $0x70] sm:$0xff] }
 0x364   : > { %1007 = vmatpush.msrb.mxu3 %v905_v61  ;;  %1131 = vmatpush.msra.mxu0 %v1127_v49  ;;  %v1115_v61 = vld [vmem:[%s2250_s7 + $0x10] sm:$0xff] }
 0x366   : > { %1008 = vmatpush.msrb.mxu3 %v904_v62  ;;  %1132 = vmatpush.msra.mxu0 %v1126_v50  ;;  %v1114_v62 = vld [vmem:[%s2250_s7 + $0x8] sm:$0xff] }
 0x368   : > { %1009 = vmatpush.msrb.mxu3 %v903_v63  ;;  %1133 = vmatpush.msra.mxu0 %v1125_v51  ;;  %v1113_v63 = vld [vmem:[%s2250_s7] sm:$0xff] }
 0x36a   : > { %1010 = vmatpush.msrb.mxu3 %v902_v1  ;;  %1134 = vmatpush.msra.mxu0 %v1124_v52 }
 0x36c   : > { %1011 = vmatpush.msrb.mxu3 %v901_v2  ;;  %1135 = vmatpush.msra.mxu0 %v1123_v53 }
 0x36e   : > { %1012 = vmatpush.msrb.mxu3 %v900_v4  ;;  %1136 = vmatpush.msra.mxu0 %v1122_v54 }
 0x370   : > { %1137 = vmatpush.msra.mxu0 %v1121_v55 }
 0x372   : > { %1138 = vmatpush.msra.mxu0 %v1120_v56 }
 0x374   : > { %1139 = vmatpush.msra.mxu0 %v1119_v57 }
 0x376   : > { %1140 = vmatpush.msra.mxu0 %v1118_v58 }
 0x378   : > { %1141 = vmatpush.msra.mxu0 %v1117_v59 }
 0x37a   : > { %1142 = vmatpush.msra.mxu0 %v1116_v60 }
 0x37c   : > { %1143 = vmatpush.msra.mxu0 %v1115_v61 }
 0x37e   : > { %1144 = vmatpush.msra.mxu0 %v1114_v62 }
 0x380   : > { %1145 = vmatpush.msra.mxu0 %v1113_v63 }
 0x3ce   : > { %v871_v35 = vpop.f32.mrf.mxu3 }
 0x3cf   : > { %1013 = vmatmul.f32.vlgmr.msrb.gmra.mxu3 %v871_v35  ;;  %v946_v38 = vrot.slane %v871_v35, 5  ;;  %v1058_v47 = vrot.slane %v871_v35, 1 }
 0x3d6   : > { %v874_v37 = vpop.f32.mrf.mxu3 }
 0x3d7   : > { %v947_v39 = vrot.slane %v874_v37, 5 }
 0x3d9   : > { %v948_v40 = vsel %vm945_vm15, %v946_v38, %v947_v39 }
 0x3da   : > { %971 = vmatmul.f32.vlgmr.msrb.gmra.mxu0 %v948_v40 }
 0x3de   : > { %v894_v41 = vpop.f32.mrf.mxu3 }
 0x3df   : > { %1360 = vmatmul.msk.f32.vlgmr.msra.gmra.mxu1 %vm390_vm6, %v894_v41  ;;  %v1059_v42 = vrot.slane %v894_v41, 1  ;;  %v949_v44 = vrot.slane %v894_v41, 5 }
 0x3e0   : > { %1174 = vmatpush.msra.mxu1 %v1154_v19 }
 0x3e2   : > { %1175 = vmatpush.msra.mxu1 %v1153_v20 }
 0x3e6   : > { %v897_v43 = vpop.f32.mrf.mxu3 }
 0x3e7   : > { %v950_v45 = vrot.slane %v897_v43, 5  ;;  %1381 = vmatmul.msk.f32.vlgmr.msrb.gmra.mxu1 %vm390_vm6, %v1059_v42 }
 0x3e9   : > { %v951_v46 = vsel %vm945_vm15, %v949_v44, %v950_v45 }
 0x3ea   : > { %1359 = vmatmul.msk.f32.vlgmr.msra.gmra.mxu2 %vm390_vm6, %v951_v46 }
 0x3f2   : > { %1079 = vmatmul.f32.vlgmr.msrb.gmra.mxu2 %v1058_v47 }
 0x452   : > { %v1014_v5 = vpop.f32.mrf.mxu3 }
 0x457   : > { %v972_v2 = vpop.f32.mrf.mxu0 }
 0x45c   : > { %v1034_v1 = vpop.f32.mrf.mxu1 }
 0x464   : > { %v1100_v6 = vpop.f32.mrf.mxu1 }
 0x46d   : > { %v992_v3 = vpop.f32.mrf.mxu2 }
 0x46e   : > { %v993_v4 = vadd.f32 %v992_v3, %v972_v2 }
 0x470   : > { %v1015_v0 = vadd.f32 %v1014_v5, %v993_v4 }
 0x472   : > { %v1035_v8 = vadd.f32 %v1034_v1, %v1015_v0 }
 0x475   : > { %v1080_v7 = vpop.f32.mrf.mxu2 }
 0x476   : > { %v1101_v9 = vadd.f32 %v1100_v6, %v1080_v7 }
 0x478   : > { %v1103_v10 = vadd.f32 %v1101_v9, %v1035_v8 }
 0x47a   : > { %v1104_v11 = vmax.f32 %v1103_v10, 0.0 }
 0x47c   : > { %v1106_v12 = vsel %vm1105_vm0, %v1104_v11, 0.0 }
 0x47d   : > { %v1107_v13 = vrot.slane %v1106_v12, 4 }
 0x47f   : > { %v1108_v14 = vadd.f32 %v1107_v13, %v1106_v12 }
 0x481   : > { %v1109_v15 = vrot.slane %v1108_v14, 2 }
 0x483   : > { %v1110_v16 = vadd.f32 %v1109_v15, %v1108_v14 }
 0x485   : > { %v1111_v17 = vrot.slane %v1110_v16, 1 }
 0x487   : > { %v1112_v18 = vadd.f32 %v1111_v17, %v1110_v16 }
 0x489   : > { %1146 = vmatmul.f32.vlgmr.msra.gmra.mxu0 %v1112_v18 }
 0x506   : > { %v1147_v22 = vpop.f32.mrf.mxu0 }
 0x507   : > { %v1148_v23 = vadd.f32 %v1147_v22, %v1129_v21 }
 0x509   : > { %vm1150_vm1 = vcmp.gt.f32.partialorder %v1148_v23, 0.0  ;;  %v1151_v24 = vmul.f32 0.2, %v1148_v23 }
 0x50b   : > { %v1152_v25 = vsel %vm1150_vm1, %v1148_v23, %v1151_v24 }
 0x50c   : > { %1382 = vmatmul.msk.f32.vlgmr.msra.gmra.mxu1 %vm1156_vm2, %v1152_v25 }
 0x589   : > { %v1177_v27 = vpop.f32.mrf.mxu1 }
 0x58a   : > { %v1178_v28 = vadd.f32 %v1177_v27, %v1155_v26 }
 0x58c   : > { %1429 = vtanh.f32 %v1178_v28 }
 0x592   : > { %v1430_v29 = vpop.eup %1429 }
 0x593   : > { %1181 = vst.msk [vmem:[%s378_s16] sm:$0x1] %vm600_vm12, %v1430_v29 }
 0x594   : > { %1458 = shalt.err (!%p1455_p3)
}
 0x595   : > { %1386 = dma.vmem_to_hbm [thread:$0]  (%p1596_p5), %s1194_s22, 16, %s1196_s24, %s1183_s29  }
 0x596 PF: > { %p1392_p4 = scmp.ge.s32.totalorder %s1493_s20, 2  ;;  %s1207_s12 = sand.u32 1, %s1481_s17  }
 0x597   : > { %s1208_s0 = scalar_lea.sflag [#allocation6], %s1207_s12 }
 0x598   : > { %p1389_p7 = pnand %p1392_p4, %p1600_p6 }
 0x59a   : > { %p1390_p8 = pneg %p1389_p7 }
 0x59c   : > { %1476 = dma.done.wait (%p1390_p8), %s1208_s0, 16  }
 0x59d   : > { %1478 = vsyncadd (%p1390_p8), %s1208_s0, 4294967280  ;;  %p21_p9 = scmp.ge.s32.totalorder %s1583_s23, 4   ;;  %s2263_s17 = smov %s1485_s18 }
 0x59e   : > { %s2264_s18 = smov %s1489_s19  ;;  %s2265_s19 = smov %s1594_s26 }
 0x59f   : > { %s2266_s20 = smov %s1583_s23  ;;  %23 = sbr.rel (!%p21_p9) target bundleno = 6 (0x6), region = 105 }
 0x5a4   :  { %1213 = vsyncpa [#allocation6], 1 }
 0x5a5   :  { %1215 = vsyncpa [#allocation6 + $0x1], 1 }

</bundles_post_ra>
